<compile_context>
chip_gen: v7x
topology: tpu7x:2x2x1
jax: 0.10.0
libtpu: 0.0.40
codegen_flags: <defaults>
</compile_context>

<pallas_src>
import functools

import jax
import jax.numpy as jnp
from jax.experimental import pallas as pl
from jax.experimental.pallas import tpu as pltpu

_VMEM_BUDGET = 8 * 1024 * 1024  # conservative working-set budget per call


def _round_up(x, m):
    return ((x + m - 1) // m) * m


def _rsoftmax_kernel(x_ref, o_ref, *, radix):
    # x_ref: (TB, card, radix, r)  -- free view of the NCHW input (no HBM transpose)
    # o_ref: (TB, radix, card, r)  -- flattens (outside) to the PyTorch output order
    x = x_ref[...].astype(jnp.float32)
    m = jnp.max(x, axis=2, keepdims=True)        # reduce over the radix (sublane) axis
    e = jnp.exp(x - m)
    s = jnp.sum(e, axis=2, keepdims=True)
    inv = pl.reciprocal(s, approx=False)         # EUP reciprocal; exact for 1e-5 parity
    y = e * inv                                  # (TB, card, radix, r)
    # card<->radix swap done in VMEM: static unroll over radix (2 or 4).  Each
    # slice keeps r in the lane dim and stores into a contiguous leading-dim
    # slice of the output block -> no extra HBM pass for the transpose.
    for j in range(radix):
        o_ref[:, j, :, :] = y[:, :, j, :].astype(o_ref.dtype)


def _sigmoid_kernel(x_ref, o_ref):
    x = x_ref[...].astype(jnp.float32)           # f32 compute (v5e has no bf16 VPU/EUP)
    o_ref[...] = jax.nn.sigmoid(x).astype(o_ref.dtype)


def _batch_tile(batch, bytes_per_row):
    tb = max(1, _VMEM_BUDGET // max(bytes_per_row, 1))
    tb = int(min(batch, tb))
    if batch >= 8 and tb >= 8:
        tb -= tb % 8
    return max(1, tb)


def rsoftmax(x, radix, cardinality):
    """Pallas implementation of rSoftMax.forward.

    x: (B, C, H, W) array (NCHW, as in the PyTorch module).
    Returns (B, C*H*W) if radix > 1 (matching torch reshape(batch, -1)),
    else sigmoid(x) with the original shape.
    """
    batch = x.shape[0]
    total = 1
    for d in x.shape[1:]:
        total *= d

    if radix > 1:
        assert total % (cardinality * radix) == 0, (
            f"C*H*W={total} must be divisible by cardinality*radix="
            f"{cardinality * radix}")
        r = total // (cardinality * radix)

        # Pure view of the NCHW input: no data movement.
        xv = x.reshape(batch, cardinality, radix, r)

        # Per-row VMEM footprint with the (8, 128) minor-dim padding, x2 for
        # double-buffering of the input and output blocks.
        in_row = cardinality * _round_up(radix, 8) * _round_up(r, 128) * 4
        out_row = radix * _round_up(cardinality, 8) * _round_up(r, 128) * 4
        tb = _batch_tile(batch, 2 * (in_row + out_row))

        out = pl.pallas_call(
            functools.partial(_rsoftmax_kernel, radix=radix),
            out_shape=jax.ShapeDtypeStruct(
                (batch, radix, cardinality, r), x.dtype),
            grid=(pl.cdiv(batch, tb),),
            in_specs=[pl.BlockSpec((tb, cardinality, radix, r),
                                   lambda b: (b, 0, 0, 0))],
            out_specs=pl.BlockSpec((tb, radix, cardinality, r),
                                   lambda b: (b, 0, 0, 0)),
            compiler_params=pltpu.CompilerParams(
                dimension_semantics=("parallel",)),
        )(xv)
        # reshape(batch, -1): output is already stored in (radix, card, r)
        # order, so this is a free reshape (no transpose pass).
        return out.reshape(batch, -1)
    else:
        flat = x.reshape(batch, total)
        # Lane-dense tiling: full rows when small / unaligned, otherwise a
        # 128-multiple lane tile sized for (in + out) double-buffering.
        tn = total if total % 128 != 0 else min(total, 4096)
        per_row = 2 * 2 * tn * 4                 # in+out, double-buffered, f32 bound
        tb = _batch_tile(batch, per_row)

        out = pl.pallas_call(
            _sigmoid_kernel,
            out_shape=jax.ShapeDtypeStruct((batch, total), x.dtype),
            grid=(pl.cdiv(batch, tb), pl.cdiv(total, tn)),
            in_specs=[pl.BlockSpec((tb, tn), lambda b, n: (b, n))],
            out_specs=pl.BlockSpec((tb, tn), lambda b, n: (b, n)),
            compiler_params=pltpu.CompilerParams(
                dimension_semantics=("parallel", "parallel")),
        )(flat)
        return out.reshape(x.shape)


def _rsoftmax_ref(x, radix, cardinality):
    """Pure-JAX reference mirroring the PyTorch code exactly."""
    batch = x.shape[0]
    if radix > 1:
        xr = x.reshape(batch, cardinality, radix, -1).transpose(0, 2, 1, 3)
        xr = jax.nn.softmax(xr, axis=1)
        return xr.reshape(batch, -1)
    return jax.nn.sigmoid(x)


if __name__ == "__main__":
    key = jax.random.PRNGKey(0)
    k1, k2, k3 = jax.random.split(key, 3)

    # 1) Typical SplAtConv2d attention input: (B, channels*radix, 1, 1)
    batch, radix, cardinality, channels = 4, 2, 2, 32
    x = jax.random.normal(k1, (batch, channels * radix, 1, 1), dtype=jnp.float32)
    y = jax.block_until_ready(rsoftmax(x, radix, cardinality))
    y_ref = _rsoftmax_ref(x, radix, cardinality)
    assert y.shape == y_ref.shape, (y.shape, y_ref.shape)
    assert jnp.allclose(y, y_ref, atol=1e-5, rtol=1e-5), "radix>1 path mismatch"

    # 2) radix > 1 with non-trivial spatial extent (card=4, radix=2 -> r=16)
    x2 = jax.random.normal(k2, (2, 32, 2, 2), dtype=jnp.float32)
    y2 = jax.block_until_ready(rsoftmax(x2, 2, 4))
    y2_ref = _rsoftmax_ref(x2, 2, 4)
    assert y2.shape == y2_ref.shape
    assert jnp.allclose(y2, y2_ref, atol=1e-5, rtol=1e-5), "radix>1 spatial mismatch"

    # 3) radix == 1 path (sigmoid), lane width = 256 (multiple of 128)
    x3 = jax.random.normal(k3, (2, 16, 4, 4), dtype=jnp.float32)
    y3 = jax.block_until_ready(rsoftmax(x3, 1, cardinality))
    y3_ref = _rsoftmax_ref(x3, 1, cardinality)
    assert y3.shape == y3_ref.shape
    assert jnp.allclose(y3, y3_ref, atol=1e-5, rtol=1e-5), "radix==1 path mismatch"

    print("KERNEL_OK")
</pallas_src>

<mosaic_0001>
module attributes {stable_mosaic.version = 11 : i64} {
  func.func @_rsoftmax_kernel(%arg0: i32, %arg1: memref<4x2x2x16xf32, #tpu.memory_space<vmem>>, %arg2: memref<4x2x2x16xf32, #tpu.memory_space<vmem>>) attributes {dimension_semantics = [#tpu.dimension_semantics<parallel>], iteration_bounds = array<i64: 1>, scalar_prefetch = 0 : i64, scratch_operands = 0 : i64, tpu.core_type = #tpu.core_type<tc>, window_params = [{transform_indices = @transform_0, window_bounds = array<i64: 4, 2, 2, 16>}, {transform_indices = @transform_1, window_bounds = array<i64: 4, 2, 2, 16>}]} {
    %c0 = arith.constant 0 : index
    %c0_0 = arith.constant 0 : index
    %c0_1 = arith.constant 0 : index
    %c0_2 = arith.constant 0 : index
    %0 = vector.load %arg1[%c0, %c0_0, %c0_1, %c0_2] : memref<4x2x2x16xf32, #tpu.memory_space<vmem>>, vector<4x2x2x16xf32>
    %cst = arith.constant dense<0xFF800000> : vector<4x2x16xf32>
    %1 = vector.multi_reduction <maximumf>, %0, %cst [2] : vector<4x2x2x16xf32> to vector<4x2x16xf32>
    %2 = vector.shape_cast %1 : vector<4x2x16xf32> to vector<4x2x1x16xf32>
    %3 = vector.broadcast %2 : vector<4x2x1x16xf32> to vector<4x2x2x16xf32>
    %4 = arith.subf %0, %3 : vector<4x2x2x16xf32>
    %5 = math.exp %4 : vector<4x2x2x16xf32>
    %cst_3 = arith.constant dense<0.000000e+00> : vector<4x2x16xf32>
    %6 = vector.multi_reduction <add>, %5, %cst_3 [2] : vector<4x2x2x16xf32> to vector<4x2x16xf32>
    %7 = vector.shape_cast %6 : vector<4x2x16xf32> to vector<4x2x1x16xf32>
    %8 = tpu.reciprocal %7 : vector<4x2x1x16xf32> -> vector<4x2x1x16xf32>
    %9 = vector.broadcast %8 : vector<4x2x1x16xf32> to vector<4x2x2x16xf32>
    %10 = arith.mulf %5, %9 : vector<4x2x2x16xf32>
    %11 = vector.extract_strided_slice %10 {offsets = [0, 0, 0, 0], sizes = [4, 2, 1, 16], strides = [1, 1, 1, 1]} : vector<4x2x2x16xf32> to vector<4x2x1x16xf32>
    %12 = vector.shape_cast %11 : vector<4x2x1x16xf32> to vector<4x2x16xf32>
    %c0_4 = arith.constant 0 : index
    %c0_5 = arith.constant 0 : index
    %c0_6 = arith.constant 0 : index
    %c0_7 = arith.constant 0 : index
    %13 = vector.load %arg2[%c0_4, %c0_5, %c0_6, %c0_7] : memref<4x2x2x16xf32, #tpu.memory_space<vmem>>, vector<4x1x2x16xf32>
    %14 = vector.shape_cast %13 : vector<4x1x2x16xf32> to vector<4x2x16xf32>
    %15 = vector.shape_cast %12 : vector<4x2x16xf32> to vector<4x1x2x16xf32>
    tpu.vector_store %arg2[%c0_4, %c0_5, %c0_6, %c0_7], %15 {strides = array<i32>} : memref<4x2x2x16xf32, #tpu.memory_space<vmem>>, vector<4x1x2x16xf32>,
    %16 = vector.extract_strided_slice %10 {offsets = [0, 0, 1, 0], sizes = [4, 2, 1, 16], strides = [1, 1, 1, 1]} : vector<4x2x2x16xf32> to vector<4x2x1x16xf32>
    %17 = vector.shape_cast %16 : vector<4x2x1x16xf32> to vector<4x2x16xf32>
    %c0_8 = arith.constant 0 : index
    %c1 = arith.constant 1 : index
    %c0_9 = arith.constant 0 : index
    %c0_10 = arith.constant 0 : index
    %18 = vector.load %arg2[%c0_8, %c1, %c0_9, %c0_10] : memref<4x2x2x16xf32, #tpu.memory_space<vmem>>, vector<4x1x2x16xf32>
    %19 = vector.shape_cast %18 : vector<4x1x2x16xf32> to vector<4x2x16xf32>
    %20 = vector.shape_cast %17 : vector<4x2x16xf32> to vector<4x1x2x16xf32>
    tpu.vector_store %arg2[%c0_8, %c1, %c0_9, %c0_10], %20 {strides = array<i32>} : memref<4x2x2x16xf32, #tpu.memory_space<vmem>>, vector<4x1x2x16xf32>,
    return
  }
  func.func @transform_0(%arg0: i32) -> (i32, i32, i32, i32) {
    %c0_i32 = arith.constant 0 : i32
    %c0_i32_0 = arith.constant 0 : i32
    %c0_i32_1 = arith.constant 0 : i32
    %c0_i32_2 = arith.constant 0 : i32
    return %arg0, %c0_i32, %c0_i32_0, %c0_i32_1 : i32, i32, i32, i32
  }
  func.func @transform_1(%arg0: i32) -> (i32, i32, i32, i32) {
    %c0_i32 = arith.constant 0 : i32
    %c0_i32_0 = arith.constant 0 : i32
    %c0_i32_1 = arith.constant 0 : i32
    %c0_i32_2 = arith.constant 0 : i32
    return %arg0, %c0_i32, %c0_i32_0, %c0_i32_1 : i32, i32, i32, i32
  }
}

</mosaic_0001>

<bundles_post_ra>
// kernel: tpu_custom_call.1
= control target key start
LH: loop header
LB: loop body
LE: loop exit
PB: predicated region body
PF: predicated region fallthrough
CT: control target
= control target key end

     0   :  { %6 = vsyncpa [#allocation3], 0  ;;  %s465_s0 = inlined_call_operand.hbm [shape: f32[4,2,2,16], index: 0, kind: input, shape index: {}]   ;;  %s466_s1 = inlined_call_operand.hbm [shape: f32[4,2,2,16], index: 1, kind: output, shape index: {}]  }
   0x1   :  { %7 = vsyncpa [#allocation4], 0  ;;  %s325_s6 = smov [#allocation2]   ;;  %s277_s10 = scalar_lea.hbm %s465_s0, 256 }
   0x2   :  { %s13_s7 = sshll.u32 %s325_s6, 4  ;;  %p278_p0 = scmp.ne.s32.totalorder %s465_s0, %s277_s10  ;;  %s14_s7 = int_to_ptr.vmem [resolvable:$true] %s13_s7 }
   0x3   :  { %p281_p1 = scmp.lt.u32.totalorder %s277_s10, %s465_s0 }
   0x5   :  { %p283_p2 = pnand %p281_p1, %p278_p0 }
   0x7   :  { %286 = shalt.err (!%p283_p2)
}
   0x8   :  { %s287_s15 = scalar_lea.vmem %s14_s7, 256  ;;  %p292_p4 = scmp.lt.s32.totalorder %s14_s7, %s14_s7 }
   0x9   :  { %p288_p3 = scmp.ne.s32.totalorder %s14_s7, %s287_s15  ;;  %p293_p5 = scmp.lt.s32.totalorder %s287_s15, %s287_s15 }
   0xb   :  { %p294_p6 = por %p293_p5, %p292_p4 }
   0xd   :  { %p295_p7 = pnand %p294_p6, %p288_p3 }
   0xf   :  { %298 = shalt.err (!%p295_p7)
}
  0x10   :  { %s326_s16 = smov 32   ;;  %s327_s17 = smov 2  }
  0x11   :  { %19 = dma.hbm_to_vmem [thread:$0]  %s465_s0, 256, %s14_s7, [#allocation3], %s326_s16, %s326_s16, %s327_s17  }
  0x12   :  { %321 = dma.done.wait [#allocation3], 256  }
  0x13   :  { %322 = vsyncadd [#allocation3], 4294967040  ;;  %vm31_vm0 = vcmask 123904   ;;  %v354_v0 = vld [vmem:[#allocation2] sm:$0x3]  ;;  %vm193_vm1 = vcmask 1041409  }
  0x14   :  { %v356_v1 = vld [vmem:[#allocation2 + $0x2] sm:$0x3]  ;;  %v358_v2 = vld [vmem:[#allocation2 + $0x4] sm:$0x3]  ;;  %v32_v3 = vsel %vm31_vm0, %v354_v0, -inf  ;;  %vm209_vm2 = vcmask 1042434  }
  0x15   :  { %v39_v4 = vsel %vm31_vm0, %v356_v1, -inf  ;;  %v364_v5 = vld [vmem:[#allocation2 + $0x6] sm:$0x3]  ;;  %v46_v6 = vsel %vm31_vm0, %v358_v2, -inf  ;;  %v33_v7 = vrot.slane %v32_v3, 4  ;;  %vm219_vm3 = vcmask 124929  }
  0x16   :  { %v40_v8 = vrot.slane %v39_v4, 4  ;;  %v47_v9 = vrot.slane %v46_v6, 4  ;;  %v53_v10 = vsel %vm31_vm0, %v364_v5, -inf  ;;  %v370_v11 = vld [vmem:[#allocation2 + $0x8] sm:$0x3]  ;;  %s328_s0 = smov [#allocation5]  }
  0x17   :  { %v54_v12 = vrot.slane %v53_v10, 4  ;;  %v372_v13 = vld [vmem:[#allocation2 + $0xa] sm:$0x3]  ;;  %v60_v14 = vsel %vm31_vm0, %v370_v11, -inf  ;;  %v376_v15 = vld [vmem:[#allocation2 + $0xc] sm:$0x3]  ;;  %v34_v16 = vmax.f32 %v32_v3, %v33_v7 }
  0x18   :  { %v41_v17 = vmax.f32 %v39_v4, %v40_v8  ;;  %v48_v18 = vmax.f32 %v46_v6, %v47_v9  ;;  %v61_v19 = vrot.slane %v60_v14, 4  ;;  %v378_v20 = vld [vmem:[#allocation2 + $0xe] sm:$0x3]  ;;  %v67_v22 = vsel %vm31_vm0, %v372_v13, -inf  ;;  %s229_s20 = sshll.u32 %s328_s0, 4  ;;  %s230_s20 = int_to_ptr.vmem [resolvable:$true] %s229_s20 }
  0x19   :  { %v55_v21 = vmax.f32 %v53_v10, %v54_v12  ;;  %v74_v23 = vsel %vm31_vm0, %v376_v15, -inf  ;;  %v81_v24 = vsel %vm31_vm0, %v378_v20, -inf  ;;  %v35_v25 = vrot.slane %v34_v16, 2  ;;  %s299_s21 = scalar_lea.vmem %s230_s20, 256  ;;  %p304_p9 = scmp.lt.s32.totalorder %s230_s20, %s230_s20 }
  0x1a   :  { %v42_v26 = vrot.slane %v41_v17, 2  ;;  %v49_v27 = vrot.slane %v48_v18, 2  ;;  %v62_v28 = vmax.f32 %v60_v14, %v61_v19  ;;  %v68_v30 = vrot.slane %v67_v22, 4  ;;  %p300_p8 = scmp.ne.s32.totalorder %s230_s20, %s299_s21  ;;  %p305_p10 = scmp.lt.s32.totalorder %s299_s21, %s299_s21 }
  0x1b   :  { %v56_v29 = vrot.slane %v55_v21, 2  ;;  %v75_v31 = vrot.slane %v74_v23, 4  ;;  %v82_v32 = vrot.slane %v81_v24, 4  ;;  %v36_v33 = vmax.f32 %v34_v16, %v35_v25 }
  0x1c   :  { %v43_v34 = vmax.f32 %v41_v17, %v42_v26  ;;  %v50_v35 = vmax.f32 %v48_v18, %v49_v27  ;;  %v63_v36 = vrot.slane %v62_v28, 2  ;;  %v69_v38 = vmax.f32 %v67_v22, %v68_v30  ;;  %p306_p11 = por %p305_p10, %p304_p9 }
  0x1d   :  { %v57_v37 = vmax.f32 %v55_v21, %v56_v29  ;;  %v76_v39 = vmax.f32 %v74_v23, %v75_v31  ;;  %v83_v40 = vmax.f32 %v81_v24, %v82_v32  ;;  %v37_v41 = vrot.slane %v36_v33, 1 }
  0x1e   :  { %v44_v42 = vrot.slane %v43_v34, 1  ;;  %v51_v43 = vrot.slane %v50_v35, 1  ;;  %v64_v44 = vmax.f32 %v62_v28, %v63_v36  ;;  %v70_v46 = vrot.slane %v69_v38, 2  ;;  %p307_p12 = pnand %p306_p11, %p300_p8 }
  0x1f   :  { %v58_v45 = vrot.slane %v57_v37, 1  ;;  %v77_v47 = vrot.slane %v76_v39, 2  ;;  %v84_v48 = vrot.slane %v83_v40, 2  ;;  %v38_v49 = vmax.f32 %v36_v33, %v37_v41 }
  0x20   :  { %v45_v50 = vmax.f32 %v43_v34, %v44_v42  ;;  %v52_v51 = vmax.f32 %v50_v35, %v51_v43  ;;  %v65_v52 = vrot.slane %v64_v44, 1  ;;  %v71_v54 = vmax.f32 %v69_v38, %v70_v46 }
  0x21   :  { %v59_v53 = vmax.f32 %v57_v37, %v58_v45  ;;  %v78_v55 = vmax.f32 %v76_v39, %v77_v47  ;;  %v85_v56 = vmax.f32 %v83_v40, %v84_v48  ;;  %v88_v57 = vsub.f32 %v354_v0, %v38_v49 }
  0x22   :  { %v89_v58 = vsub.f32 %v356_v1, %v45_v50  ;;  %v90_v59 = vsub.f32 %v358_v2, %v52_v51  ;;  %v66_v60 = vmax.f32 %v64_v44, %v65_v52  ;;  %v72_v62 = vrot.slane %v71_v54, 1 }
  0x23   :  { %v91_v61 = vsub.f32 %v364_v5, %v59_v53  ;;  %v79_v63 = vrot.slane %v78_v55, 1  ;;  %v86_v3 = vrot.slane %v85_v56, 1  ;;  %v96_v4 = vmul.f32 1.442695, %v88_v57 }
  0x24   :  { %v98_v6 = vmul.f32 1.442695, %v89_v58  ;;  %v100_v7 = vmul.f32 1.442695, %v90_v59  ;;  %v92_v8 = vsub.f32 %v370_v11, %v66_v60  ;;  %v73_v10 = vmax.f32 %v71_v54, %v72_v62 }
  0x25   :  { %v102_v9 = vmul.f32 1.442695, %v91_v61  ;;  %v80_v12 = vmax.f32 %v78_v55, %v79_v63  ;;  %v87_v14 = vmax.f32 %v85_v56, %v86_v3  ;;  %245 = vpow2.f32 %v96_v4 }
  0x26   :  { %v104_v0 = vmul.f32 1.442695, %v92_v8  ;;  %247 = vpow2.f32 %v98_v6  ;;  %v93_v1 = vsub.f32 %v372_v13, %v73_v10 }
  0x27   :  { %v94_v2 = vsub.f32 %v376_v15, %v80_v12  ;;  %v95_v5 = vsub.f32 %v378_v20, %v87_v14  ;;  %249 = vpow2.f32 %v100_v7 }
  0x28   :  { %251 = vpow2.f32 %v102_v9  ;;  %v106_v16 = vmul.f32 1.442695, %v93_v1 }
  0x29   :  { %v108_v17 = vmul.f32 1.442695, %v94_v2  ;;  %v110_v18 = vmul.f32 1.442695, %v95_v5  ;;  %253 = vpow2.f32 %v104_v0 }
  0x2a   :  { %255 = vpow2.f32 %v106_v16 }
  0x2b   :  { %257 = vpow2.f32 %v108_v17 }
  0x2c   :  { %259 = vpow2.f32 %v110_v18 }
  0x2f   :  { %v394_v11 = vpop.eup %245 }
  0x30   :  { %v396_v19 = vpop.eup %247  ;;  %v112_v13 = vsel %vm31_vm0, %v394_v11, 0.0 }
  0x31   :  { %v400_v21 = vpop.eup %249  ;;  %v113_v15 = vrot.slane %v112_v13, 4  ;;  %v119_v20 = vsel %vm31_vm0, %v396_v19, 0.0 }
  0x32   :  { %v404_v22 = vpop.eup %251  ;;  %v120_v23 = vrot.slane %v119_v20, 4  ;;  %v126_v24 = vsel %vm31_vm0, %v400_v21, 0.0 }
  0x33   :  { %v408_v25 = vpop.eup %253  ;;  %v114_v26 = vadd.f32 %v113_v15, %v112_v13  ;;  %v127_v27 = vrot.slane %v126_v24, 4  ;;  %v133_v28 = vsel %vm31_vm0, %v404_v22, 0.0 }
  0x34   :  { %v412_v29 = vpop.eup %255  ;;  %v121_v30 = vadd.f32 %v120_v23, %v119_v20  ;;  %v134_v31 = vrot.slane %v133_v28, 4  ;;  %v140_v32 = vsel %vm31_vm0, %v408_v25, 0.0 }
  0x35   :  { %v416_v33 = vpop.eup %257  ;;  %v115_v34 = vrot.slane %v114_v26, 2  ;;  %v128_v35 = vadd.f32 %v127_v27, %v126_v24  ;;  %v141_v36 = vrot.slane %v140_v32, 4  ;;  %v147_v37 = vsel %vm31_vm0, %v412_v29, 0.0 }
  0x36   :  { %v420_v38 = vpop.eup %259  ;;  %v122_v39 = vrot.slane %v121_v30, 2  ;;  %v135_v40 = vadd.f32 %v134_v31, %v133_v28  ;;  %v148_v41 = vrot.slane %v147_v37, 4  ;;  %v154_v42 = vsel %vm31_vm0, %v416_v33, 0.0 }
  0x37   :  { %v116_v43 = vadd.f32 %v115_v34, %v114_v26  ;;  %v129_v44 = vrot.slane %v128_v35, 2  ;;  %v142_v45 = vadd.f32 %v141_v36, %v140_v32  ;;  %v155_v46 = vrot.slane %v154_v42, 4 }
  0x38   :  { %v123_v47 = vadd.f32 %v122_v39, %v121_v30  ;;  %v136_v48 = vrot.slane %v135_v40, 2  ;;  %v149_v49 = vadd.f32 %v148_v41, %v147_v37  ;;  %v161_v50 = vsel %vm31_vm0, %v420_v38, 0.0 }
  0x39   :  { %v117_v51 = vrot.slane %v116_v43, 1  ;;  %v130_v52 = vadd.f32 %v129_v44, %v128_v35  ;;  %v143_v53 = vrot.slane %v142_v45, 2  ;;  %v156_v54 = vadd.f32 %v155_v46, %v154_v42 }
  0x3a   :  { %v124_v55 = vrot.slane %v123_v47, 1  ;;  %v137_v56 = vadd.f32 %v136_v48, %v135_v40  ;;  %v150_v57 = vrot.slane %v149_v49, 2  ;;  %v162_v58 = vrot.slane %v161_v50, 4 }
  0x3b   :  { %v118_v59 = vadd.f32 %v117_v51, %v116_v43  ;;  %v131_v60 = vrot.slane %v130_v52, 1  ;;  %v144_v61 = vadd.f32 %v143_v53, %v142_v45  ;;  %v157_v62 = vrot.slane %v156_v54, 2 }
  0x3c   :  { %v125_v63 = vadd.f32 %v124_v55, %v123_v47  ;;  %v138_v3 = vrot.slane %v137_v56, 1  ;;  %v151_v4 = vadd.f32 %v150_v57, %v149_v49  ;;  %v163_v6 = vadd.f32 %v162_v58, %v161_v50 }
  0x3d   :  { %261 = vrcp.f32 %v118_v59  ;;  %v132_v7 = vadd.f32 %v131_v60, %v130_v52  ;;  %v145_v8 = vrot.slane %v144_v61, 1  ;;  %v158_v9 = vadd.f32 %v157_v62, %v156_v54 }
  0x3e   :  { %263 = vrcp.f32 %v125_v63  ;;  %v139_v10 = vadd.f32 %v138_v3, %v137_v56  ;;  %v152_v12 = vrot.slane %v151_v4, 1  ;;  %v164_v14 = vrot.slane %v163_v6, 2 }
  0x3f   :  { %265 = vrcp.f32 %v132_v7  ;;  %v146_v0 = vadd.f32 %v145_v8, %v144_v61  ;;  %v159_v1 = vrot.slane %v158_v9, 1 }
  0x40   :  { %267 = vrcp.f32 %v139_v10  ;;  %v153_v2 = vadd.f32 %v152_v12, %v151_v4  ;;  %v165_v5 = vadd.f32 %v164_v14, %v163_v6 }
  0x41   :  { %269 = vrcp.f32 %v146_v0  ;;  %v160_v16 = vadd.f32 %v159_v1, %v158_v9 }
  0x42   :  { %271 = vrcp.f32 %v153_v2  ;;  %v166_v17 = vrot.slane %v165_v5, 1 }
  0x43   :  { %273 = vrcp.f32 %v160_v16 }
  0x44   :  { %v167_v18 = vadd.f32 %v166_v17, %v165_v5 }
  0x46   :  { %275 = vrcp.f32 %v167_v18 }
  0x47   :  { %v262_v13 = vpop.eup %261 }
  0x48   :  { %v264_v15 = vpop.eup %263  ;;  %v176_v23 = vmul.f32 %v262_v13, %v394_v11 }
  0x49   :  { %v266_v20 = vpop.eup %265  ;;  %v177_v24 = vmul.f32 %v264_v15, %v396_v19 }
  0x4a   :  { %v268_v26 = vpop.eup %267  ;;  %v178_v30 = vmul.f32 %v266_v20, %v400_v21 }
  0x4b   :  { %v270_v27 = vpop.eup %269  ;;  %v192_v28 = vrot.slane %v177_v24, 7  ;;  %v179_v31 = vmul.f32 %v268_v26, %v404_v22 }
  0x4c   :  { %v272_v32 = vpop.eup %271  ;;  %v180_v34 = vmul.f32 %v270_v27, %v408_v25 }
  0x4d   :  { %v194_v35 = vsel %vm193_vm1, %v192_v28, %v176_v23  ;;  %v195_v36 = vrot.slane %v179_v31, 7  ;;  %v181_v11 = vmul.f32 %v272_v32, %v412_v29  ;;  %v210_v19 = vsel %vm209_vm2, %v192_v28, %v176_v23  ;;  %v274_v37 = vpop.eup %273 }
  0x4e   :  { %205 = vst.msk [vmem:[#allocation5] sm:$0x3] %vm31_vm0, %v194_v35  ;;  %v182_v29 = vmul.f32 %v274_v37, %v416_v33 }
  0x4f   :  { %220 = vst.msk [vmem:[#allocation5 + $0x1] sm:$0x6] %vm219_vm3, %v210_v19  ;;  %v196_v21 = vsel %vm193_vm1, %v195_v36, %v178_v30  ;;  %v197_v39 = vrot.slane %v181_v11, 7  ;;  %v211_v22 = vsel %vm209_vm2, %v195_v36, %v178_v30 }
  0x50   :  { %v276_v40 = vpop.eup %275  ;;  %206 = vst.msk [vmem:[#allocation5 + $0x4] sm:$0x3] %vm31_vm0, %v196_v21 }
  0x51   :  { %221 = vst.msk [vmem:[#allocation5 + $0x5] sm:$0x6] %vm219_vm3, %v211_v22  ;;  %v198_v25 = vsel %vm193_vm1, %v197_v39, %v180_v34  ;;  %v183_v41 = vmul.f32 %v276_v40, %v420_v38  ;;  %v212_v42 = vsel %vm209_vm2, %v197_v39, %v180_v34 }
  0x52   :  { %207 = vst.msk [vmem:[#allocation5 + $0x8] sm:$0x3] %vm31_vm0, %v198_v25 }
  0x53   :  { %222 = vst.msk [vmem:[#allocation5 + $0x9] sm:$0x6] %vm219_vm3, %v212_v42  ;;  %v199_v43 = vrot.slane %v183_v41, 7 }
  0x55   :  { %v200_v44 = vsel %vm193_vm1, %v199_v43, %v182_v29  ;;  %v213_v45 = vsel %vm209_vm2, %v199_v43, %v182_v29 }
  0x56   :  { %208 = vst.msk [vmem:[#allocation5 + $0xc] sm:$0x3] %vm31_vm0, %v200_v44 }
  0x57   :  { %223 = vst.msk [vmem:[#allocation5 + $0xd] sm:$0x6] %vm219_vm3, %v213_v45 }
  0x58   :  { %310 = shalt.err (!%p307_p12)
}
  0x59   :  { %s311_s24 = scalar_lea.hbm %s466_s1, 256 }
  0x5a   :  { %p312_p13 = scmp.ne.s32.totalorder %s466_s1, %s311_s24  ;;  %p315_p0 = scmp.lt.u32.totalorder %s311_s24, %s466_s1 }
  0x5c   :  { %p317_p1 = pnand %p315_p0, %p312_p13 }
  0x5e   :  { %320 = shalt.err (!%p317_p1)
}
  0x5f   :  { %235 = dma.vmem_to_hbm [thread:$0]  %s230_s20, 256, %s466_s1, [#allocation4], %s326_s16, %s326_s16, %s327_s17  }
  0x60   :  { %323 = dma.done.wait [#allocation4], 256  }
  0x61   :  { %324 = vsyncadd [#allocation4], 4294967040 }
  0x62   :  { %239 = vsyncpa [#allocation3], 1 }
  0x63   :  { %240 = vsyncpa [#allocation4], 1 }

</bundles_post_ra>
